<compile_context>
chip_gen: v5e
topology: v5e:2x2
jax: 0.10.0
libtpu: 0.0.40
codegen_flags: <defaults>
</compile_context>

<pallas_src>
import numpy as np
from math import exp

import jax
import jax.numpy as jnp
from jax.experimental import pallas as pl
from jax.experimental.pallas import tpu as pltpu


WINDOW_SIZE = 11
SIGMA = 1.5
C1 = 0.01 ** 2
C2 = 0.03 ** 2


def gaussian_1d(window_size, sigma):
    # Deterministic, matches PyTorch gaussian() (float32, normalized).
    g = np.array(
        [exp(-(x - window_size // 2) ** 2 / float(2 * sigma ** 2)) for x in range(window_size)],
        dtype=np.float32,
    )
    return (g / g.sum()).astype(np.float32)


def toeplitz_same(n, g1d):
    """Banded (n, n) matrix A with A[i, r] = g[r - i + pad].

    Left-multiplying a plane by A performs a 'same' 1-D Gaussian conv along the
    row axis under zero padding (the truncated band encodes the zero pad)."""
    win = g1d.shape[0]
    pad = win // 2
    a = np.zeros((n, n), dtype=np.float32)
    for i in range(n):
        for k in range(win):
            r = i + k - pad
            if 0 <= r < n:
                a[i, r] = float(g1d[k])
    return a


def make_ssim_kernel(cblk, H, W):
    CH = cblk * H          # rows per channel-block
    NQ = 5                 # x1, x2, x1*x1, x2*x2, x1*x2
    CW = cblk * W

    def kernel(ah_ref, aw_ref, x1_ref, x2_ref, out_ref, stk_ref, wide_ref):
        # x*_ref block: (cblk*H, W) — cblk stacked (H, W) planes.
        x1 = x1_ref[...].astype(jnp.float32)
        x2 = x2_ref[...].astype(jnp.float32)

        # Stage the 5 quantities stacked along M so one MXU matmul does the
        # W-direction Gaussian conv for all of them.
        stk_ref[0 * CH:1 * CH, :] = x1
        stk_ref[1 * CH:2 * CH, :] = x2
        stk_ref[2 * CH:3 * CH, :] = x1 * x1
        stk_ref[3 * CH:4 * CH, :] = x2 * x2
        stk_ref[4 * CH:5 * CH, :] = x1 * x2

        # W(lane)-direction conv for all 5*cblk planes: (5*CH, W) @ (W, W) on MXU.
        t = jnp.dot(stk_ref[...], aw_ref[...], preferred_element_type=jnp.float32)
        stk_ref[...] = t  # reuse scratch so the re-staging below slices a Ref

        # Re-stage planes side-by-side along lanes so the H-direction conv is a
        # single 2-D MXU matmul as well: (H, 5*cblk*W).
        for k in range(NQ * cblk):
            wide_ref[:, k * W:(k + 1) * W] = stk_ref[k * H:(k + 1) * H, :]

        # H(sublane)-direction conv for all planes: (H, H) @ (H, 5*cblk*W) on MXU.
        y = jnp.dot(ah_ref[...], wide_ref[...], preferred_element_type=jnp.float32)

        mu1 = y[:, 0 * CW:1 * CW]
        mu2 = y[:, 1 * CW:2 * CW]
        e11 = y[:, 2 * CW:3 * CW]
        e22 = y[:, 3 * CW:4 * CW]
        e12 = y[:, 4 * CW:5 * CW]

        mu1_sq = mu1 * mu1
        mu2_sq = mu2 * mu2
        mu1_mu2 = mu1 * mu2
        sigma1_sq = e11 - mu1_sq
        sigma2_sq = e22 - mu2_sq
        sigma12 = e12 - mu1_mu2

        ssim_map = ((2.0 * mu1_mu2 + C1) * (2.0 * sigma12 + C2)) / (
            (mu1_sq + mu2_sq + C1) * (sigma1_sq + sigma2_sq + C2)
        )  # (H, cblk*W)

        # Lane-dense partial reduction: per-column sums; final per-plane sum and
        # mean are done in the wrapper (tiny).
        out_ref[0] = jnp.sum(ssim_map, axis=0, keepdims=True)  # (1, cblk*W)

    return kernel


def _pick_cblk(nc, h, max_cblk=8):
    # Prefer >=2 grid steps (pipelining + both v7x TensorCores), the largest
    # channel block <= max_cblk, and a sublane-aligned (cblk*h % 8 == 0) block.
    best = nc  # whole-array block always satisfies the tiling rule
    for d in range(min(nc, max_cblk), 0, -1):
        if nc % d == 0 and nc // d >= 2 and (d * h) % 8 == 0:
            best = d
            break
    return best


def ssim_pallas(img1, img2, window_size=WINDOW_SIZE, size_average=True):
    N, C, H, W = img1.shape
    assert img2.shape == img1.shape
    NC = N * C

    cblk = _pick_cblk(NC, H)
    n_blocks = NC // cblk
    CH = cblk * H

    g1d = gaussian_1d(window_size, SIGMA)
    a_h = jnp.asarray(toeplitz_same(H, g1d))        # left multiplier  (H, H)
    a_w = jnp.asarray(toeplitz_same(W, g1d).T)      # right multiplier (W, W)

    # Flatten all (batch, channel) planes onto the row axis — free reshape,
    # no padded copies in HBM.
    x1 = img1.reshape(NC * H, W)
    x2 = img2.reshape(NC * H, W)

    # TODO(synk): for very large H*W (>=512^2) switch to halo'd row-strip tiling
    # so double-buffered inputs + intermediates stay under v7x's 64 MiB VMEM.
    kernel = make_ssim_kernel(cblk, H, W)

    col_sums = pl.pallas_call(
        kernel,
        out_shape=jax.ShapeDtypeStruct((n_blocks, 1, cblk * W), jnp.float32),
        grid_spec=pltpu.PrefetchScalarGridSpec(
            num_scalar_prefetch=0,
            grid=(n_blocks,),
            in_specs=[
                pl.BlockSpec((H, H), lambda b: (0, 0)),     # A_h (constant per step)
                pl.BlockSpec((W, W), lambda b: (0, 0)),     # A_w (constant per step)
                pl.BlockSpec((CH, W), lambda b: (b, 0)),    # img1 planes
                pl.BlockSpec((CH, W), lambda b: (b, 0)),    # img2 planes
            ],
            out_specs=pl.BlockSpec((1, 1, cblk * W), lambda b: (b, 0, 0)),
            scratch_shapes=[
                pltpu.VMEM((5 * CH, W), jnp.float32),           # stacked quantities / T
                pltpu.VMEM((H, 5 * cblk * W), jnp.float32),     # lane-wide staging for A_h matmul
            ],
        ),
        compiler_params=pltpu.CompilerParams(
            dimension_semantics=("parallel",),
        ),
    )(a_h, a_w, x1, x2)

    per_plane = jnp.sum(col_sums.reshape(NC, W), axis=1).reshape(N, C)
    if size_average:
        return jnp.sum(per_plane) / (N * C * H * W)
    else:
        # PyTorch: ssim_map.mean(1).mean(1).mean(1) -> per-batch mean over C,H,W
        return jnp.sum(per_plane, axis=1) / (C * H * W)


def ssim_reference(img1, img2, window_size=WINDOW_SIZE, size_average=True):
    # Pure-JAX reference (lax conv) for validation only.
    N, C, H, W = img1.shape
    pad = window_size // 2
    g = gaussian_1d(window_size, SIGMA)
    w2 = jnp.asarray(np.outer(g, g), jnp.float32)
    window = jnp.broadcast_to(w2[None, None], (C, 1, window_size, window_size))

    def conv(x):
        return jax.lax.conv_general_dilated(
            x, window, (1, 1), [(pad, pad), (pad, pad)],
            feature_group_count=C,
            dimension_numbers=("NCHW", "OIHW", "NCHW"),
            precision=jax.lax.Precision.HIGHEST,
        )

    mu1, mu2 = conv(img1), conv(img2)
    mu1_sq, mu2_sq, mu1_mu2 = mu1 * mu1, mu2 * mu2, mu1 * mu2
    s1 = conv(img1 * img1) - mu1_sq
    s2 = conv(img2 * img2) - mu2_sq
    s12 = conv(img1 * img2) - mu1_mu2
    ssim_map = ((2 * mu1_mu2 + C1) * (2 * s12 + C2)) / ((mu1_sq + mu2_sq + C1) * (s1 + s2 + C2))
    if size_average:
        return jnp.mean(ssim_map)
    return ssim_map.mean(axis=(1, 2, 3))


if __name__ == "__main__":
    key = jax.random.PRNGKey(0)
    k1, k2 = jax.random.split(key)
    img1 = jax.random.uniform(k1, (2, 4, 16, 16), dtype=jnp.float32)
    img2 = jax.random.uniform(k2, (2, 4, 16, 16), dtype=jnp.float32)

    out = ssim_pallas(img1, img2)
    out = jax.block_until_ready(out)
    ref = ssim_reference(img1, img2)
    # Tolerance leaves margin for MXU f32 pass rounding vs XLA's conv path.
    assert np.allclose(np.asarray(out), np.asarray(ref), atol=1e-3, rtol=1e-3), (out, ref)

    out_pb = jax.block_until_ready(ssim_pallas(img1, img2, size_average=False))
    ref_pb = ssim_reference(img1, img2, size_average=False)
    assert np.allclose(np.asarray(out_pb), np.asarray(ref_pb), atol=1e-3, rtol=1e-3), (out_pb, ref_pb)

    print("KERNEL_OK")
</pallas_src>

<mosaic_0001>
module attributes {stable_mosaic.version = 11 : i64} {
  func.func @kernel(%arg0: i32, %arg1: memref<16x16xf32, #tpu.memory_space<vmem>>, %arg2: memref<16x16xf32, #tpu.memory_space<vmem>>, %arg3: memref<64x16xf32, #tpu.memory_space<vmem>>, %arg4: memref<64x16xf32, #tpu.memory_space<vmem>>, %arg5: memref<1x1x64xf32, #tpu.memory_space<vmem>>, %arg6: memref<320x16xf32, #tpu.memory_space<vmem>>, %arg7: memref<16x320xf32, #tpu.memory_space<vmem>>) attributes {dimension_semantics = [#tpu.dimension_semantics<parallel>], iteration_bounds = array<i64: 2>, scalar_prefetch = 0 : i64, scratch_operands = 2 : i64, tpu.core_type = #tpu.core_type<tc>, window_params = [{pipeline_mode = #tpu.pipeline_mode<synchronous>, transform_indices = @transform_0, window_bounds = array<i64: 16, 16>}, {pipeline_mode = #tpu.pipeline_mode<synchronous>, transform_indices = @transform_1, window_bounds = array<i64: 16, 16>}, {transform_indices = @transform_2, window_bounds = array<i64: 64, 16>}, {transform_indices = @transform_3, window_bounds = array<i64: 64, 16>}, {transform_indices = @transform_4, window_bounds = array<i64: 1, 1, 64>}]} {
    %c0 = arith.constant 0 : index
    %c0_0 = arith.constant 0 : index
    %0 = vector.load %arg3[%c0, %c0_0] : memref<64x16xf32, #tpu.memory_space<vmem>>, vector<64x16xf32>
    %c0_1 = arith.constant 0 : index
    %c0_2 = arith.constant 0 : index
    %1 = vector.load %arg4[%c0_1, %c0_2] : memref<64x16xf32, #tpu.memory_space<vmem>>, vector<64x16xf32>
    %c0_3 = arith.constant 0 : index
    %c0_4 = arith.constant 0 : index
    %2 = vector.load %arg6[%c0_3, %c0_4] : memref<320x16xf32, #tpu.memory_space<vmem>>, vector<64x16xf32>
    tpu.vector_store %arg6[%c0_3, %c0_4], %0 {strides = array<i32>} : memref<320x16xf32, #tpu.memory_space<vmem>>, vector<64x16xf32>,
    %c64 = arith.constant 64 : index
    %c0_5 = arith.constant 0 : index
    %3 = vector.load %arg6[%c64, %c0_5] : memref<320x16xf32, #tpu.memory_space<vmem>>, vector<64x16xf32>
    tpu.vector_store %arg6[%c64, %c0_5], %1 {strides = array<i32>} : memref<320x16xf32, #tpu.memory_space<vmem>>, vector<64x16xf32>,
    %4 = arith.mulf %0, %0 : vector<64x16xf32>
    %c128 = arith.constant 128 : index
    %c0_6 = arith.constant 0 : index
    %5 = vector.load %arg6[%c128, %c0_6] : memref<320x16xf32, #tpu.memory_space<vmem>>, vector<64x16xf32>
    tpu.vector_store %arg6[%c128, %c0_6], %4 {strides = array<i32>} : memref<320x16xf32, #tpu.memory_space<vmem>>, vector<64x16xf32>,
    %6 = arith.mulf %1, %1 : vector<64x16xf32>
    %c192 = arith.constant 192 : index
    %c0_7 = arith.constant 0 : index
    %7 = vector.load %arg6[%c192, %c0_7] : memref<320x16xf32, #tpu.memory_space<vmem>>, vector<64x16xf32>
    tpu.vector_store %arg6[%c192, %c0_7], %6 {strides = array<i32>} : memref<320x16xf32, #tpu.memory_space<vmem>>, vector<64x16xf32>,
    %8 = arith.mulf %0, %1 : vector<64x16xf32>
    %c256 = arith.constant 256 : index
    %c0_8 = arith.constant 0 : index
    %9 = vector.load %arg6[%c256, %c0_8] : memref<320x16xf32, #tpu.memory_space<vmem>>, vector<64x16xf32>
    tpu.vector_store %arg6[%c256, %c0_8], %8 {strides = array<i32>} : memref<320x16xf32, #tpu.memory_space<vmem>>, vector<64x16xf32>,
    %c0_9 = arith.constant 0 : index
    %c0_10 = arith.constant 0 : index
    %10 = vector.load %arg6[%c0_9, %c0_10] : memref<320x16xf32, #tpu.memory_space<vmem>>, vector<320x16xf32>
    %c0_11 = arith.constant 0 : index
    %c0_12 = arith.constant 0 : index
    %11 = vector.load %arg2[%c0_11, %c0_12] : memref<16x16xf32, #tpu.memory_space<vmem>>, vector<16x16xf32>
    %cst = arith.constant dense<0.000000e+00> : vector<320x16xf32>
    %12 = tpu.matmul %10, %11, %cst {dimension_numbers = #tpu.dot_dimension_numbers<[1], [0], [0], [1], [0, 0, 1, 1], [], []>} : vector<320x16xf32>, vector<16x16xf32>, vector<320x16xf32> -> vector<320x16xf32>
    %c0_13 = arith.constant 0 : index
    %c0_14 = arith.constant 0 : index
    %13 = vector.load %arg6[%c0_13, %c0_14] : memref<320x16xf32, #tpu.memory_space<vmem>>, vector<320x16xf32>
    tpu.vector_store %arg6[%c0_13, %c0_14], %12 {strides = array<i32>} : memref<320x16xf32, #tpu.memory_space<vmem>>, vector<320x16xf32>,
    %c0_15 = arith.constant 0 : index
    %c0_16 = arith.constant 0 : index
    %14 = vector.load %arg6[%c0_15, %c0_16] : memref<320x16xf32, #tpu.memory_space<vmem>>, vector<16x16xf32>
    %c0_17 = arith.constant 0 : index
    %c0_18 = arith.constant 0 : index
    %15 = vector.load %arg7[%c0_17, %c0_18] : memref<16x320xf32, #tpu.memory_space<vmem>>, vector<16x16xf32>
    tpu.vector_store %arg7[%c0_17, %c0_18], %14 {strides = array<i32>} : memref<16x320xf32, #tpu.memory_space<vmem>>, vector<16x16xf32>,
    %c16 = arith.constant 16 : index
    %c0_19 = arith.constant 0 : index
    %16 = vector.load %arg6[%c16, %c0_19] : memref<320x16xf32, #tpu.memory_space<vmem>>, vector<16x16xf32>
    %c0_20 = arith.constant 0 : index
    %c16_21 = arith.constant 16 : index
    %17 = vector.load %arg7[%c0_20, %c16_21] : memref<16x320xf32, #tpu.memory_space<vmem>>, vector<16x16xf32>
    tpu.vector_store %arg7[%c0_20, %c16_21], %16 {strides = array<i32>} : memref<16x320xf32, #tpu.memory_space<vmem>>, vector<16x16xf32>,
    %c32 = arith.constant 32 : index
    %c0_22 = arith.constant 0 : index
    %18 = vector.load %arg6[%c32, %c0_22] : memref<320x16xf32, #tpu.memory_space<vmem>>, vector<16x16xf32>
    %c0_23 = arith.constant 0 : index
    %c32_24 = arith.constant 32 : index
    %19 = vector.load %arg7[%c0_23, %c32_24] : memref<16x320xf32, #tpu.memory_space<vmem>>, vector<16x16xf32>
    tpu.vector_store %arg7[%c0_23, %c32_24], %18 {strides = array<i32>} : memref<16x320xf32, #tpu.memory_space<vmem>>, vector<16x16xf32>,
    %c48 = arith.constant 48 : index
    %c0_25 = arith.constant 0 : index
    %20 = vector.load %arg6[%c48, %c0_25] : memref<320x16xf32, #tpu.memory_space<vmem>>, vector<16x16xf32>
    %c0_26 = arith.constant 0 : index
    %c48_27 = arith.constant 48 : index
    %21 = vector.load %arg7[%c0_26, %c48_27] : memref<16x320xf32, #tpu.memory_space<vmem>>, vector<16x16xf32>
    tpu.vector_store %arg7[%c0_26, %c48_27], %20 {strides = array<i32>} : memref<16x320xf32, #tpu.memory_space<vmem>>, vector<16x16xf32>,
    %c64_28 = arith.constant 64 : index
    %c0_29 = arith.constant 0 : index
    %22 = vector.load %arg6[%c64_28, %c0_29] : memref<320x16xf32, #tpu.memory_space<vmem>>, vector<16x16xf32>
    %c0_30 = arith.constant 0 : index
    %c64_31 = arith.constant 64 : index
    %23 = vector.load %arg7[%c0_30, %c64_31] : memref<16x320xf32, #tpu.memory_space<vmem>>, vector<16x16xf32>
    tpu.vector_store %arg7[%c0_30, %c64_31], %22 {strides = array<i32>} : memref<16x320xf32, #tpu.memory_space<vmem>>, vector<16x16xf32>,
    %c80 = arith.constant 80 : index
    %c0_32 = arith.constant 0 : index
    %24 = vector.load %arg6[%c80, %c0_32] : memref<320x16xf32, #tpu.memory_space<vmem>>, vector<16x16xf32>
    %c0_33 = arith.constant 0 : index
    %c80_34 = arith.constant 80 : index
    %25 = vector.load %arg7[%c0_33, %c80_34] : memref<16x320xf32, #tpu.memory_space<vmem>>, vector<16x16xf32>
    tpu.vector_store %arg7[%c0_33, %c80_34], %24 {strides = array<i32>} : memref<16x320xf32, #tpu.memory_space<vmem>>, vector<16x16xf32>,
    %c96 = arith.constant 96 : index
    %c0_35 = arith.constant 0 : index
    %26 = vector.load %arg6[%c96, %c0_35] : memref<320x16xf32, #tpu.memory_space<vmem>>, vector<16x16xf32>
    %c0_36 = arith.constant 0 : index
    %c96_37 = arith.constant 96 : index
    %27 = vector.load %arg7[%c0_36, %c96_37] : memref<16x320xf32, #tpu.memory_space<vmem>>, vector<16x16xf32>
    tpu.vector_store %arg7[%c0_36, %c96_37], %26 {strides = array<i32>} : memref<16x320xf32, #tpu.memory_space<vmem>>, vector<16x16xf32>,
    %c112 = arith.constant 112 : index
    %c0_38 = arith.constant 0 : index
    %28 = vector.load %arg6[%c112, %c0_38] : memref<320x16xf32, #tpu.memory_space<vmem>>, vector<16x16xf32>
    %c0_39 = arith.constant 0 : index
    %c112_40 = arith.constant 112 : index
    %29 = vector.load %arg7[%c0_39, %c112_40] : memref<16x320xf32, #tpu.memory_space<vmem>>, vector<16x16xf32>
    tpu.vector_store %arg7[%c0_39, %c112_40], %28 {strides = array<i32>} : memref<16x320xf32, #tpu.memory_space<vmem>>, vector<16x16xf32>,
    %c128_41 = arith.constant 128 : index
    %c0_42 = arith.constant 0 : index
    %30 = vector.load %arg6[%c128_41, %c0_42] : memref<320x16xf32, #tpu.memory_space<vmem>>, vector<16x16xf32>
    %c0_43 = arith.constant 0 : index
    %c128_44 = arith.constant 128 : index
    %31 = vector.load %arg7[%c0_43, %c128_44] : memref<16x320xf32, #tpu.memory_space<vmem>>, vector<16x16xf32>
    tpu.vector_store %arg7[%c0_43, %c128_44], %30 {strides = array<i32>} : memref<16x320xf32, #tpu.memory_space<vmem>>, vector<16x16xf32>,
    %c144 = arith.constant 144 : index
    %c0_45 = arith.constant 0 : index
    %32 = vector.load %arg6[%c144, %c0_45] : memref<320x16xf32, #tpu.memory_space<vmem>>, vector<16x16xf32>
    %c0_46 = arith.constant 0 : index
    %c144_47 = arith.constant 144 : index
    %33 = vector.load %arg7[%c0_46, %c144_47] : memref<16x320xf32, #tpu.memory_space<vmem>>, vector<16x16xf32>
    tpu.vector_store %arg7[%c0_46, %c144_47], %32 {strides = array<i32>} : memref<16x320xf32, #tpu.memory_space<vmem>>, vector<16x16xf32>,
    %c160 = arith.constant 160 : index
    %c0_48 = arith.constant 0 : index
    %34 = vector.load %arg6[%c160, %c0_48] : memref<320x16xf32, #tpu.memory_space<vmem>>, vector<16x16xf32>
    %c0_49 = arith.constant 0 : index
    %c160_50 = arith.constant 160 : index
    %35 = vector.load %arg7[%c0_49, %c160_50] : memref<16x320xf32, #tpu.memory_space<vmem>>, vector<16x16xf32>
    tpu.vector_store %arg7[%c0_49, %c160_50], %34 {strides = array<i32>} : memref<16x320xf32, #tpu.memory_space<vmem>>, vector<16x16xf32>,
    %c176 = arith.constant 176 : index
    %c0_51 = arith.constant 0 : index
    %36 = vector.load %arg6[%c176, %c0_51] : memref<320x16xf32, #tpu.memory_space<vmem>>, vector<16x16xf32>
    %c0_52 = arith.constant 0 : index
    %c176_53 = arith.constant 176 : index
    %37 = vector.load %arg7[%c0_52, %c176_53] : memref<16x320xf32, #tpu.memory_space<vmem>>, vector<16x16xf32>
    tpu.vector_store %arg7[%c0_52, %c176_53], %36 {strides = array<i32>} : memref<16x320xf32, #tpu.memory_space<vmem>>, vector<16x16xf32>,
    %c192_54 = arith.constant 192 : index
    %c0_55 = arith.constant 0 : index
    %38 = vector.load %arg6[%c192_54, %c0_55] : memref<320x16xf32, #tpu.memory_space<vmem>>, vector<16x16xf32>
    %c0_56 = arith.constant 0 : index
    %c192_57 = arith.constant 192 : index
    %39 = vector.load %arg7[%c0_56, %c192_57] : memref<16x320xf32, #tpu.memory_space<vmem>>, vector<16x16xf32>
    tpu.vector_store %arg7[%c0_56, %c192_57], %38 {strides = array<i32>} : memref<16x320xf32, #tpu.memory_space<vmem>>, vector<16x16xf32>,
    %c208 = arith.constant 208 : index
    %c0_58 = arith.constant 0 : index
    %40 = vector.load %arg6[%c208, %c0_58] : memref<320x16xf32, #tpu.memory_space<vmem>>, vector<16x16xf32>
    %c0_59 = arith.constant 0 : index
    %c208_60 = arith.constant 208 : index
    %41 = vector.load %arg7[%c0_59, %c208_60] : memref<16x320xf32, #tpu.memory_space<vmem>>, vector<16x16xf32>
    tpu.vector_store %arg7[%c0_59, %c208_60], %40 {strides = array<i32>} : memref<16x320xf32, #tpu.memory_space<vmem>>, vector<16x16xf32>,
    %c224 = arith.constant 224 : index
    %c0_61 = arith.constant 0 : index
    %42 = vector.load %arg6[%c224, %c0_61] : memref<320x16xf32, #tpu.memory_space<vmem>>, vector<16x16xf32>
    %c0_62 = arith.constant 0 : index
    %c224_63 = arith.constant 224 : index
    %43 = vector.load %arg7[%c0_62, %c224_63] : memref<16x320xf32, #tpu.memory_space<vmem>>, vector<16x16xf32>
    tpu.vector_store %arg7[%c0_62, %c224_63], %42 {strides = array<i32>} : memref<16x320xf32, #tpu.memory_space<vmem>>, vector<16x16xf32>,
    %c240 = arith.constant 240 : index
    %c0_64 = arith.constant 0 : index
    %44 = vector.load %arg6[%c240, %c0_64] : memref<320x16xf32, #tpu.memory_space<vmem>>, vector<16x16xf32>
    %c0_65 = arith.constant 0 : index
    %c240_66 = arith.constant 240 : index
    %45 = vector.load %arg7[%c0_65, %c240_66] : memref<16x320xf32, #tpu.memory_space<vmem>>, vector<16x16xf32>
    tpu.vector_store %arg7[%c0_65, %c240_66], %44 {strides = array<i32>} : memref<16x320xf32, #tpu.memory_space<vmem>>, vector<16x16xf32>,
    %c256_67 = arith.constant 256 : index
    %c0_68 = arith.constant 0 : index
    %46 = vector.load %arg6[%c256_67, %c0_68] : memref<320x16xf32, #tpu.memory_space<vmem>>, vector<16x16xf32>
    %c0_69 = arith.constant 0 : index
    %c256_70 = arith.constant 256 : index
    %47 = vector.load %arg7[%c0_69, %c256_70] : memref<16x320xf32, #tpu.memory_space<vmem>>, vector<16x16xf32>
    tpu.vector_store %arg7[%c0_69, %c256_70], %46 {strides = array<i32>} : memref<16x320xf32, #tpu.memory_space<vmem>>, vector<16x16xf32>,
    %c272 = arith.constant 272 : index
    %c0_71 = arith.constant 0 : index
    %48 = vector.load %arg6[%c272, %c0_71] : memref<320x16xf32, #tpu.memory_space<vmem>>, vector<16x16xf32>
    %c0_72 = arith.constant 0 : index
    %c272_73 = arith.constant 272 : index
    %49 = vector.load %arg7[%c0_72, %c272_73] : memref<16x320xf32, #tpu.memory_space<vmem>>, vector<16x16xf32>
    tpu.vector_store %arg7[%c0_72, %c272_73], %48 {strides = array<i32>} : memref<16x320xf32, #tpu.memory_space<vmem>>, vector<16x16xf32>,
    %c288 = arith.constant 288 : index
    %c0_74 = arith.constant 0 : index
    %50 = vector.load %arg6[%c288, %c0_74] : memref<320x16xf32, #tpu.memory_space<vmem>>, vector<16x16xf32>
    %c0_75 = arith.constant 0 : index
    %c288_76 = arith.constant 288 : index
    %51 = vector.load %arg7[%c0_75, %c288_76] : memref<16x320xf32, #tpu.memory_space<vmem>>, vector<16x16xf32>
    tpu.vector_store %arg7[%c0_75, %c288_76], %50 {strides = array<i32>} : memref<16x320xf32, #tpu.memory_space<vmem>>, vector<16x16xf32>,
    %c304 = arith.constant 304 : index
    %c0_77 = arith.constant 0 : index
    %52 = vector.load %arg6[%c304, %c0_77] : memref<320x16xf32, #tpu.memory_space<vmem>>, vector<16x16xf32>
    %c0_78 = arith.constant 0 : index
    %c304_79 = arith.constant 304 : index
    %53 = vector.load %arg7[%c0_78, %c304_79] : memref<16x320xf32, #tpu.memory_space<vmem>>, vector<16x16xf32>
    tpu.vector_store %arg7[%c0_78, %c304_79], %52 {strides = array<i32>} : memref<16x320xf32, #tpu.memory_space<vmem>>, vector<16x16xf32>,
    %c0_80 = arith.constant 0 : index
    %c0_81 = arith.constant 0 : index
    %54 = vector.load %arg1[%c0_80, %c0_81] : memref<16x16xf32, #tpu.memory_space<vmem>>, vector<16x16xf32>
    %c0_82 = arith.constant 0 : index
    %c0_83 = arith.constant 0 : index
    %55 = vector.load %arg7[%c0_82, %c0_83] : memref<16x320xf32, #tpu.memory_space<vmem>>, vector<16x320xf32>
    %cst_84 = arith.constant dense<0.000000e+00> : vector<16x320xf32>
    %56 = tpu.matmul %54, %55, %cst_84 {dimension_numbers = #tpu.dot_dimension_numbers<[1], [0], [0], [1], [0, 0, 1, 1], [], []>} : vector<16x16xf32>, vector<16x320xf32>, vector<16x320xf32> -> vector<16x320xf32>
    %57 = vector.extract_strided_slice %56 {offsets = [0, 0], sizes = [16, 64], strides = [1, 1]} : vector<16x320xf32> to vector<16x64xf32>
    %58 = vector.extract_strided_slice %56 {offsets = [0, 64], sizes = [16, 64], strides = [1, 1]} : vector<16x320xf32> to vector<16x64xf32>
    %59 = vector.extract_strided_slice %56 {offsets = [0, 128], sizes = [16, 64], strides = [1, 1]} : vector<16x320xf32> to vector<16x64xf32>
    %60 = vector.extract_strided_slice %56 {offsets = [0, 192], sizes = [16, 64], strides = [1, 1]} : vector<16x320xf32> to vector<16x64xf32>
    %61 = vector.extract_strided_slice %56 {offsets = [0, 256], sizes = [16, 64], strides = [1, 1]} : vector<16x320xf32> to vector<16x64xf32>
    %62 = arith.mulf %57, %57 : vector<16x64xf32>
    %63 = arith.mulf %58, %58 : vector<16x64xf32>
    %64 = arith.mulf %57, %58 : vector<16x64xf32>
    %65 = arith.subf %59, %62 : vector<16x64xf32>
    %66 = arith.subf %60, %63 : vector<16x64xf32>
    %67 = arith.subf %61, %64 : vector<16x64xf32>
    %cst_85 = arith.constant 2.000000e+00 : f32
    %68 = vector.broadcast %cst_85 : f32 to vector<16x64xf32>
    %69 = arith.mulf %68, %64 : vector<16x64xf32>
    %cst_86 = arith.constant 9.99999974E-5 : f32
    %70 = vector.broadcast %cst_86 : f32 to vector<16x64xf32>
    %71 = arith.addf %69, %70 : vector<16x64xf32>
    %cst_87 = arith.constant 2.000000e+00 : f32
    %72 = vector.broadcast %cst_87 : f32 to vector<16x64xf32>
    %73 = arith.mulf %72, %67 : vector<16x64xf32>
    %cst_88 = arith.constant 8.99999984E-4 : f32
    %74 = vector.broadcast %cst_88 : f32 to vector<16x64xf32>
    %75 = arith.addf %73, %74 : vector<16x64xf32>
    %76 = arith.mulf %71, %75 : vector<16x64xf32>
    %77 = arith.addf %62, %63 : vector<16x64xf32>
    %cst_89 = arith.constant 9.99999974E-5 : f32
    %78 = vector.broadcast %cst_89 : f32 to vector<16x64xf32>
    %79 = arith.addf %77, %78 : vector<16x64xf32>
    %80 = arith.addf %65, %66 : vector<16x64xf32>
    %cst_90 = arith.constant 8.99999984E-4 : f32
    %81 = vector.broadcast %cst_90 : f32 to vector<16x64xf32>
    %82 = arith.addf %80, %81 : vector<16x64xf32>
    %83 = arith.mulf %79, %82 : vector<16x64xf32>
    %84 = arith.divf %76, %83 : vector<16x64xf32>
    %cst_91 = arith.constant dense<0.000000e+00> : vector<64xf32>
    %85 = vector.multi_reduction <add>, %84, %cst_91 [0] : vector<16x64xf32> to vector<64xf32>
    %86 = vector.shape_cast %85 : vector<64xf32> to vector<1x64xf32>
    %c0_92 = arith.constant 0 : index
    %c0_93 = arith.constant 0 : index
    %c0_94 = arith.constant 0 : index
    %87 = vector.load %arg5[%c0_92, %c0_93, %c0_94] : memref<1x1x64xf32, #tpu.memory_space<vmem>>, vector<1x1x64xf32>
    %88 = vector.shape_cast %87 : vector<1x1x64xf32> to vector<1x64xf32>
    %89 = vector.shape_cast %86 : vector<1x64xf32> to vector<1x1x64xf32>
    tpu.vector_store %arg5[%c0_92, %c0_93, %c0_94], %89 {strides = array<i32>} : memref<1x1x64xf32, #tpu.memory_space<vmem>>, vector<1x1x64xf32>,
    return
  }
  func.func @transform_0(%arg0: i32) -> (i32, i32) {
    %c0_i32 = arith.constant 0 : i32
    %c0_i32_0 = arith.constant 0 : i32
    %c0_i32_1 = arith.constant 0 : i32
    return %c0_i32, %c0_i32_0 : i32, i32
  }
  func.func @transform_1(%arg0: i32) -> (i32, i32) {
    %c0_i32 = arith.constant 0 : i32
    %c0_i32_0 = arith.constant 0 : i32
    %c0_i32_1 = arith.constant 0 : i32
    return %c0_i32, %c0_i32_0 : i32, i32
  }
  func.func @transform_2(%arg0: i32) -> (i32, i32) {
    %c0_i32 = arith.constant 0 : i32
    %c0_i32_0 = arith.constant 0 : i32
    return %arg0, %c0_i32 : i32, i32
  }
  func.func @transform_3(%arg0: i32) -> (i32, i32) {
    %c0_i32 = arith.constant 0 : i32
    %c0_i32_0 = arith.constant 0 : i32
    return %arg0, %c0_i32 : i32, i32
  }
  func.func @transform_4(%arg0: i32) -> (i32, i32, i32) {
    %c0_i32 = arith.constant 0 : i32
    %c0_i32_0 = arith.constant 0 : i32
    %c0_i32_1 = arith.constant 0 : i32
    return %arg0, %c0_i32, %c0_i32_0 : i32, i32, i32
  }
}

</mosaic_0001>

<bundles_post_ra>
// kernel: tpu_custom_call.1
= control target key start
LH: loop header
LB: loop body
LE: loop exit
PB: predicated region body
PF: predicated region fallthrough
CT: control target
= control target key end

     0   :  { %9 = vsyncpa [#allocation5], 0  ;;  %s1753_s0 = inlined_call_operand.vmem [shape: f32[16,16], index: 0, kind: input, shape index: {}]   ;;  %s1754_s1 = inlined_call_operand.vmem [shape: f32[16,16], index: 1, kind: input, shape index: {}]   ;;  %s1755_s2 = inlined_call_operand.vmem [shape: f32[128,16], index: 2, kind: input, shape index: {}]   ;;  %s1756_s3 = inlined_call_operand.vmem [shape: f32[128,16], index: 3, kind: input, shape index: {}]   ;;  %s1757_s4 = inlined_call_operand.hbm [shape: f32[2,1,64], index: 4, kind: output, shape index: {}]  }
   0x1   :  { %11 = vsyncpa [#allocation5 + $0x1], 0  ;;  %s1327_s15 = smov 0   ;;  %s1329_s16 = smov 0  }
   0x2   :  { %s1331_s17 = smov 0   ;;  %s1333_s18 = smov 0  }
   0x3 LB: > { %s1348_s19 = sadd.s32 4294967295, %s1293_s18   ;;  %s1119_s20 = sadd.s32 4294967294, %s1293_s18   ;;  %s1293_s18 = sphi %s1333_s18, %s1763_s18   ;;  %s1289_s17 = sphi %s1331_s17, %s1762_s17   ;;  %s1285_s16 = sphi %s1329_s16, %s1761_s16   ;;  %s1281_s15 = sphi %s1327_s15, %s1760_s15  }
   0x4   : > { %s1352_s21 = sadd.s32 1, %s1293_s18   ;;  %s118_s22 = sadd.s32 1, %s1289_s17 }
   0x5   : > { %s115_s23 = ssub.s32 %s1293_s18, %s1352_s21  ;;  %p128_p0 = scmp.ne.s32.totalorder %s1289_s17, %s1285_s16 }
   0x6   : > { %p116_p1 = scmp.eq.s32.totalorder %s115_s23, 0  ;;  %p129_p2 = scmp.eq.s32.totalorder %s1348_s19, 1 }
   0x7   : > { %p134_p3 = scmp.ne.s32.totalorder %s1285_s16, %s1281_s15  ;;  %p135_p4 = scmp.eq.s32.totalorder %s1119_s20, 1 }
   0x8   : > { %s1363_s24 = scalar_select %p116_p1, %s1289_s17, %s118_s22  }
   0x9   : > { %p1365_p5 = por %p129_p2, %p128_p0  ;;  %p1369_p6 = por %p135_p4, %p134_p3 }
   0xa   : > { %p1122_p7 = scmp.ge.s32.totalorder %s1293_s18, 1  ;;  %p177_p8 = scmp.lt.s32.totalorder %s1293_s18, 3 }
   0xc   : > { %p178_p9 = pnand %p1122_p7, %p177_p8 }
   0xd   : > { %s1123_s5 = sshll.u32 (!%p178_p9), %s1348_s19, 3  ;;  %s1295_s13 = smov (!%p178_p9), 96  }
   0xe   : > { %181 = sbr.rel (%p178_p9) target bundleno = 690 (0x2b2), region = 36  ;;  %p208_p10 = scmp.lt.s32.totalorder (!%p178_p9), %s1123_s5, 15 }
   0xf   : > { %s1296_s14 = smov (!%p178_p9), 48   ;;  %s1297_s20 = smov (!%p178_p9), 16  }
  0x10   : > { %s1298_s22 = smov (!%p178_p9), 64   ;;  %s1299_s23 = smov (!%p178_p9), 32  }
  0x11   : > { %s1300_s27 = smov (!%p178_p9), 80   ;;  %s1301_s28 = smov (!%p178_p9), 112  }
  0x12   : > { %s205_s7 = sand.u32 (!%p178_p9), 1, %s1285_s16   ;;  %s1048_s10 = scalar_lea.hbm (!%p178_p9), %s1757_s4, %s1348_s19 }
  0x13   : > { %v341_v0 = vld [vmem:[%s1754_s1 + $0x8] sm:$0xff]  ;;  %v340_v1 = vld [vmem:[%s1754_s1] sm:$0xff]  ;;  %s1765_s5 = smov (!%p208_p10, %s1123_s5), 15  ;;  %vm235_vm0 = vcmask 130048   ;;  %vm653_vm1 = vcmask 261248   ;;  %vm666_vm2 = vcmask 392448  }
  0x14   : > { %476 = vmatpush.msra.mxu0 %v341_v0  ;;  %1175 = vmatpush.msra.mxu1 %v341_v0  ;;  %s1124_s6 = sshll.u32 %s1765_s5, 3  ;;  %vm679_vm3 = vcmask 523648   ;;  %vm692_vm4 = vcmask 654848   ;;  %vm705_vm5 = vcmask 786048   ;;  %vm718_vm6 = vcmask 917248   ;;  %s206_s11 = scalar_lea.vmem [#allocation4], %s205_s7 }
  0x15   : > { %1176 = vmatpush.msra.mxu2 %v341_v0  ;;  %1177 = vmatpush.msra.mxu3 %v341_v0  ;;  %s1385_s9 = scalar_lea.vmem %s1755_s2, %s1124_s6  ;;  %s1390_s12 = scalar_lea.vmem %s1756_s3, %s1124_s6  ;;  %vm731_vm7 = vcmask 1048448  }
  0x16   : > { %477 = vmatpush.msra.mxu0 %v340_v1  ;;  %1178 = vmatpush.msra.mxu1 %v340_v1  ;;  %v1393_v2 = vld [vmem:[%s1385_s9] sm:$0xff]  ;;  %v1399_v4 = vld [vmem:[%s1385_s9 + $0x8] sm:$0xff]  ;;  %v1407_v6 = vld [vmem:[%s1385_s9 + $0x30] sm:$0xff] }
  0x17   : > { %1179 = vmatpush.msra.mxu2 %v340_v1  ;;  %1180 = vmatpush.msra.mxu3 %v340_v1  ;;  %v1396_v3 = vld [vmem:[%s1390_s12 + $0x20] sm:$0xff]  ;;  %236 = vst.msk [vmem:[#allocation2] sm:$0xff] %vm235_vm0, %v1393_v2  ;;  %v1404_v5 = vld [vmem:[%s1390_s12 + $0x28] sm:$0xff]  ;;  %v258_v7 = vmul.f32 %v1407_v6, %v1407_v6  ;;  %v1414_v8 = vld [vmem:[%s1385_s9 + $0x38] sm:$0xff]  ;;  %v252_v21 = vmul.f32 %v1393_v2, %v1393_v2 }
  0x18   : > { %248 = vst.msk [vmem:[#allocation2 + $0x60] sm:$0xff] %vm235_vm0, %v1396_v3  ;;  %v1421_v9 = vld [vmem:[%s1385_s9 + $0x10] sm:$0xff]  ;;  %v259_v11 = vmul.f32 %v1414_v8, %v1414_v8  ;;  %v1432_v12 = vld [vmem:[%s1390_s12] sm:$0xff]  ;;  %v1439_v14 = vld [vmem:[%s1385_s9 + $0x18] sm:$0xff]  ;;  %v253_v27 = vmul.f32 %v1399_v4, %v1399_v4  ;;  %v272_v37 = vmul.f32 %v1396_v3, %v1396_v3  ;;  %v273_v42 = vmul.f32 %v1404_v5, %v1404_v5 }
  0x19   : > { %237 = vst.msk [vmem:[#allocation2 + $0x8] sm:$0xff] %vm235_vm0, %v1399_v4  ;;  %v1425_v10 = vld [vmem:[%s1390_s12 + $0x30] sm:$0xff]  ;;  %v1444_v16 = vld [vmem:[%s1390_s12 + $0x38] sm:$0xff]  ;;  %v268_v17 = vmul.f32 %v1432_v12, %v1432_v12  ;;  %v1452_v18 = vld [vmem:[%s1390_s12 + $0x8] sm:$0xff]  ;;  %v254_v31 = vmul.f32 %v1421_v9, %v1421_v9  ;;  %v255_v35 = vmul.f32 %v1439_v14, %v1439_v14 }
  0x1a   : > { %249 = vst.msk [vmem:[#allocation2 + $0x68] sm:$0xff] %vm235_vm0, %v1404_v5  ;;  %v1459_v20 = vld [vmem:[%s1385_s9 + $0x20] sm:$0xff]  ;;  %v269_v22 = vmul.f32 %v1452_v18, %v1452_v18  ;;  %v1470_v24 = vld [vmem:[%s1390_s12 + $0x10] sm:$0xff]  ;;  %v1476_v26 = vld [vmem:[%s1385_s9 + $0x28] sm:$0xff]  ;;  %v274_v47 = vmul.f32 %v1425_v10, %v1425_v10  ;;  %v275_v51 = vmul.f32 %v1444_v16, %v1444_v16 }
  0x1b   : > { %266 = vst.msk [vmem:[#allocation2 + $0xb0] sm:$0xff] %vm235_vm0, %v258_v7  ;;  %v270_v28 = vmul.f32 %v1470_v24, %v1470_v24  ;;  %v1485_v29 = vld [vmem:[%s1390_s12 + $0x18] sm:$0xff]  ;;  %v256_v40 = vmul.f32 %v1459_v20, %v1459_v20  ;;  %v257_v45 = vmul.f32 %v1476_v26, %v1476_v26  ;;  %v284_v7 = vmul.f32 %v1432_v12, %v1393_v2  ;;  %s1050_s12 = sshll.u32 %s206_s11, 4  ;;  %s1051_s12 = int_to_ptr.vmem [resolvable:$true] %s1050_s12 }
  0x1c   : > { %242 = vst.msk [vmem:[#allocation2 + $0x30] sm:$0xff] %vm235_vm0, %v1407_v6  ;;  %v271_v32 = vmul.f32 %v1485_v29, %v1485_v29 }
  0x1d   : > { %238 = vst.msk [vmem:[#allocation2 + $0x10] sm:$0xff] %vm235_vm0, %v1421_v9 }
  0x1e   : > { %v300_v13 = vld [vmem:[#allocation2] sm:$0xff]  ;;  %250 = vst.msk [vmem:[#allocation2 + $0x70] sm:$0xff] %vm235_vm0, %v1425_v10 }
  0x1f   : > { %1127 = vmatmul.msk.f32.vlgmr.msra.gmra.mxu0 %vm235_vm0, %v300_v13  ;;  %v312_v15 = vld [vmem:[#allocation2 + $0x60] sm:$0xff]  ;;  %267 = vst.msk [vmem:[#allocation2 + $0xb8] sm:$0xff] %vm235_vm0, %v259_v11  ;;  %v285_v11 = vmul.f32 %v1452_v18, %v1399_v4  ;;  %v287_v4 = vmul.f32 %v1485_v29, %v1439_v14 }
  0x20   : > { %1139 = vmatmul.msk.f32.vlgmr.msra.gmra.mxu1 %vm235_vm0, %v312_v15  ;;  %243 = vst.msk [vmem:[#allocation2 + $0x38] sm:$0xff] %vm235_vm0, %v1414_v8  ;;  %v301_v23 = vld [vmem:[#allocation2 + $0x8] sm:$0xff]  ;;  %v286_v15 = vmul.f32 %v1470_v24, %v1421_v9 }
  0x21   : > { %239 = vst.msk [vmem:[#allocation2 + $0x18] sm:$0xff] %vm235_vm0, %v1439_v14  ;;  %v313_v25 = vld [vmem:[#allocation2 + $0x68] sm:$0xff] }
  0x22   : > { %v322_v19 = vld [vmem:[#allocation2 + $0xb0] sm:$0xff]  ;;  %251 = vst.msk [vmem:[#allocation2 + $0x78] sm:$0xff] %vm235_vm0, %v1444_v16 }
  0x23   : > { %1149 = vmatmul.msk.f32.vlgmr.msra.gmra.mxu2 %vm235_vm0, %v322_v19  ;;  %276 = vst.msk [vmem:[#allocation2 + $0xc0] sm:$0xff] %vm235_vm0, %v268_v17  ;;  %v306_v52 = vld [vmem:[#allocation2 + $0x30] sm:$0xff] }
  0x24   : > { %244 = vst.msk [vmem:[#allocation2 + $0x40] sm:$0xff] %vm235_vm0, %v1432_v12  ;;  %v302_v33 = vld [vmem:[#allocation2 + $0x10] sm:$0xff] }
  0x25   : > { %240 = vst.msk [vmem:[#allocation2 + $0x20] sm:$0xff] %vm235_vm0, %v1459_v20  ;;  %v314_v34 = vld [vmem:[#allocation2 + $0x70] sm:$0xff] }
  0x26   : > { %260 = vst.msk [vmem:[#allocation2 + $0x80] sm:$0xff] %vm235_vm0, %v252_v21  ;;  %v323_v30 = vld [vmem:[#allocation2 + $0xb8] sm:$0xff] }
  0x27   : > { %1128 = vmatmul.msk.f32.gmra.mxu0 %vm235_vm0, %v301_v23  ;;  %277 = vst.msk [vmem:[#allocation2 + $0xc8] sm:$0xff] %vm235_vm0, %v269_v22  ;;  %v307_v55 = vld [vmem:[#allocation2 + $0x38] sm:$0xff]  ;;  %v288_v23 = vmul.f32 %v1396_v3, %v1459_v20  ;;  %v289_v20 = vmul.f32 %v1404_v5, %v1476_v26  ;;  %v290_v5 = vmul.f32 %v1425_v10, %v1407_v6 }
  0x28   : > { %1140 = vmatmul.msk.f32.gmra.mxu1 %vm235_vm0, %v313_v25  ;;  %245 = vst.msk [vmem:[#allocation2 + $0x48] sm:$0xff] %vm235_vm0, %v1452_v18  ;;  %v303_v38 = vld [vmem:[#allocation2 + $0x18] sm:$0xff]  ;;  %v291_v10 = vmul.f32 %v1444_v16, %v1414_v8 }
  0x29   : > { %241 = vst.msk [vmem:[#allocation2 + $0x28] sm:$0xff] %vm235_vm0, %v1476_v26  ;;  %v315_v39 = vld [vmem:[#allocation2 + $0x78] sm:$0xff] }
  0x2a   : > { %261 = vst.msk [vmem:[#allocation2 + $0x88] sm:$0xff] %vm235_vm0, %v253_v27  ;;  %v324_v36 = vld [vmem:[#allocation2 + $0xc0] sm:$0xff] }
  0x2b   : > { %1150 = vmatmul.msk.f32.gmra.mxu2 %vm235_vm0, %v323_v30  ;;  %278 = vst.msk [vmem:[#allocation2 + $0xd0] sm:$0xff] %vm235_vm0, %v270_v28  ;;  %v308_v58 = vld [vmem:[#allocation2 + $0x40] sm:$0xff] }
  0x2c   : > { %246 = vst.msk [vmem:[#allocation2 + $0x50] sm:$0xff] %vm235_vm0, %v1470_v24  ;;  %v304_v43 = vld [vmem:[#allocation2 + $0x20] sm:$0xff] }
  0x2d   : > { %262 = vst.msk [vmem:[#allocation2 + $0x90] sm:$0xff] %vm235_vm0, %v254_v31  ;;  %v316_v44 = vld [vmem:[#allocation2 + $0x80] sm:$0xff] }
  0x2e   : > { %279 = vst.msk [vmem:[#allocation2 + $0xd8] sm:$0xff] %vm235_vm0, %v271_v32  ;;  %v325_v41 = vld [vmem:[#allocation2 + $0xc8] sm:$0xff] }
  0x2f   : > { %1129 = vmatmul.msk.f32.gmra.mxu0 %vm235_vm0, %v302_v33  ;;  %247 = vst.msk [vmem:[#allocation2 + $0x58] sm:$0xff] %vm235_vm0, %v1485_v29  ;;  %v309_v61 = vld [vmem:[#allocation2 + $0x48] sm:$0xff] }
  0x30   : > { %1141 = vmatmul.msk.f32.gmra.mxu1 %vm235_vm0, %v314_v34  ;;  %263 = vst.msk [vmem:[#allocation2 + $0x98] sm:$0xff] %vm235_vm0, %v255_v35  ;;  %v305_v48 = vld [vmem:[#allocation2 + $0x28] sm:$0xff] }
  0x31   : > { %280 = vst.msk [vmem:[#allocation2 + $0xe0] sm:$0xff] %vm235_vm0, %v272_v37  ;;  %v317_v49 = vld [vmem:[#allocation2 + $0x88] sm:$0xff] }
  0x32   : > { %264 = vst.msk [vmem:[#allocation2 + $0xa0] sm:$0xff] %vm235_vm0, %v256_v40  ;;  %v326_v46 = vld [vmem:[#allocation2 + $0xd0] sm:$0xff] }
  0x33   : > { %1151 = vmatmul.msk.f32.gmra.mxu2 %vm235_vm0, %v324_v36  ;;  %281 = vst.msk [vmem:[#allocation2 + $0xe8] sm:$0xff] %vm235_vm0, %v273_v42  ;;  %v310_v0 = vld [vmem:[#allocation2 + $0x50] sm:$0xff] }
  0x34   : > { %265 = vst.msk [vmem:[#allocation2 + $0xa8] sm:$0xff] %vm235_vm0, %v257_v45  ;;  %v318_v53 = vld [vmem:[#allocation2 + $0x90] sm:$0xff] }
  0x35   : > { %282 = vst.msk [vmem:[#allocation2 + $0xf0] sm:$0xff] %vm235_vm0, %v274_v47  ;;  %v327_v50 = vld [vmem:[#allocation2 + $0xd8] sm:$0xff] }
  0x36   : > { %283 = vst.msk [vmem:[#allocation2 + $0xf8] sm:$0xff] %vm235_vm0, %v275_v51  ;;  %v311_v1 = vld [vmem:[#allocation2 + $0x58] sm:$0xff] }
  0x37   : > { %1130 = vmatmul.msk.f32.gmra.mxu0 %vm235_vm0, %v303_v38  ;;  %v319_v56 = vld [vmem:[#allocation2 + $0x98] sm:$0xff]  ;;  %292 = vst.msk [vmem:[#allocation2 + $0x100] sm:$0xff] %vm235_vm0, %v284_v7 }
  0x38   : > { %1142 = vmatmul.msk.f32.gmra.mxu1 %vm235_vm0, %v315_v39  ;;  %v328_v54 = vld [vmem:[#allocation2 + $0xe0] sm:$0xff]  ;;  %293 = vst.msk [vmem:[#allocation2 + $0x108] sm:$0xff] %vm235_vm0, %v285_v11 }
  0x39   : > { %v320_v59 = vld [vmem:[#allocation2 + $0xa0] sm:$0xff]  ;;  %294 = vst.msk [vmem:[#allocation2 + $0x110] sm:$0xff] %vm235_vm0, %v286_v15 }
  0x3a   : > { %v329_v57 = vld [vmem:[#allocation2 + $0xe8] sm:$0xff]  ;;  %295 = vst.msk [vmem:[#allocation2 + $0x118] sm:$0xff] %vm235_vm0, %v287_v4 }
  0x3b   : > { %1152 = vmatmul.msk.f32.gmra.mxu2 %vm235_vm0, %v325_v41  ;;  %v321_v62 = vld [vmem:[#allocation2 + $0xa8] sm:$0xff]  ;;  %296 = vst.msk [vmem:[#allocation2 + $0x120] sm:$0xff] %vm235_vm0, %v288_v23 }
  0x3c   : > { %v330_v60 = vld [vmem:[#allocation2 + $0xf0] sm:$0xff]  ;;  %297 = vst.msk [vmem:[#allocation2 + $0x128] sm:$0xff] %vm235_vm0, %v289_v20 }
  0x3d   : > { %v331_v63 = vld [vmem:[#allocation2 + $0xf8] sm:$0xff]  ;;  %298 = vst.msk [vmem:[#allocation2 + $0x130] sm:$0xff] %vm235_vm0, %v290_v5 }
  0x3e   : > { %v332_v13 = vld [vmem:[#allocation2 + $0x100] sm:$0xff]  ;;  %299 = vst.msk [vmem:[#allocation2 + $0x138] sm:$0xff] %vm235_vm0, %v291_v10 }
  0x3f   : > { %1131 = vmatmul.msk.f32.gmra.mxu0 %vm235_vm0, %v304_v43  ;;  %1159 = vmatmul.msk.f32.vlgmr.msra.gmra.mxu3 %vm235_vm0, %v332_v13  ;;  %v333_v17 = vld [vmem:[#allocation2 + $0x108] sm:$0xff] }
  0x40   : > { %1143 = vmatmul.msk.f32.gmra.mxu1 %vm235_vm0, %v316_v44  ;;  %v334_v12 = vld [vmem:[#allocation2 + $0x110] sm:$0xff] }
  0x41   : > { %v335_v24 = vld [vmem:[#allocation2 + $0x118] sm:$0xff] }
  0x42   : > { %v336_v30 = vld [vmem:[#allocation2 + $0x120] sm:$0xff] }
  0x43   : > { %1153 = vmatmul.msk.f32.gmra.mxu2 %vm235_vm0, %v326_v46  ;;  %v337_v26 = vld [vmem:[#allocation2 + $0x128] sm:$0xff] }
  0x44   : > { %v338_v6 = vld [vmem:[#allocation2 + $0x130] sm:$0xff] }
  0x45   : > { %v339_v8 = vld [vmem:[#allocation2 + $0x138] sm:$0xff] }
  0x47   : > { %1132 = vmatmul.msk.f32.gmra.mxu0 %vm235_vm0, %v305_v48  ;;  %1160 = vmatmul.msk.f32.gmra.mxu3 %vm235_vm0, %v333_v17 }
  0x48   : > { %1144 = vmatmul.msk.f32.gmra.mxu1 %vm235_vm0, %v317_v49 }
  0x4b   : > { %1154 = vmatmul.msk.f32.gmra.mxu2 %vm235_vm0, %v327_v50 }
  0x4f   : > { %1133 = vmatmul.msk.f32.gmra.mxu0 %vm235_vm0, %v306_v52  ;;  %1161 = vmatmul.msk.f32.gmra.mxu3 %vm235_vm0, %v334_v12 }
  0x50   : > { %1145 = vmatmul.msk.f32.gmra.mxu1 %vm235_vm0, %v318_v53 }
  0x53   : > { %1155 = vmatmul.msk.f32.gmra.mxu2 %vm235_vm0, %v328_v54 }
  0x57   : > { %1134 = vmatmul.msk.f32.gmra.mxu0 %vm235_vm0, %v307_v55  ;;  %1162 = vmatmul.msk.f32.gmra.mxu3 %vm235_vm0, %v335_v24 }
  0x58   : > { %1146 = vmatmul.msk.f32.gmra.mxu1 %vm235_vm0, %v319_v56 }
  0x5b   : > { %1156 = vmatmul.msk.f32.gmra.mxu2 %vm235_vm0, %v329_v57 }
  0x5f   : > { %1135 = vmatmul.msk.f32.gmra.mxu0 %vm235_vm0, %v308_v58  ;;  %1163 = vmatmul.msk.f32.gmra.mxu3 %vm235_vm0, %v336_v30 }
  0x60   : > { %1147 = vmatmul.msk.f32.gmra.mxu1 %vm235_vm0, %v320_v59 }
  0x63   : > { %1157 = vmatmul.msk.f32.gmra.mxu2 %vm235_vm0, %v330_v60 }
  0x67   : > { %1136 = vmatmul.msk.f32.gmra.mxu0 %vm235_vm0, %v309_v61  ;;  %1164 = vmatmul.msk.f32.gmra.mxu3 %vm235_vm0, %v337_v26 }
  0x68   : > { %1148 = vmatmul.msk.f32.gmra.mxu1 %vm235_vm0, %v321_v62 }
  0x6b   : > { %1158 = vmatmul.msk.f32.gmra.mxu2 %vm235_vm0, %v331_v63 }
  0x6f   : > { %1137 = vmatmul.msk.f32.gmra.mxu0 %vm235_vm0, %v310_v0  ;;  %1165 = vmatmul.msk.f32.gmra.mxu3 %vm235_vm0, %v338_v6 }
  0x77   : > { %1138 = vmatmul.msk.f32.gmra.mxu0 %vm235_vm0, %v311_v1  ;;  %1166 = vmatmul.msk.f32.gmra.mxu3 %vm235_vm0, %v339_v8 }
  0x9c   : > { %v479_v19 = vpop.f32.mrf.mxu0 }
  0x9d   : > { %599 = vst.msk [vmem:[#allocation2] sm:$0xff] %vm235_vm0, %v479_v19  ;;  %v515_v2 = vpop.f32.mrf.mxu1 }
  0x9e   : > { %611 = vst.msk [vmem:[#allocation2 + $0x60] sm:$0xff] %vm235_vm0, %v515_v2 }
  0xa4   : > { %v482_v9 = vpop.f32.mrf.mxu0  ;;  %v639_v21 = vld [vmem:[#allocation2] sm:$0xff] }
  0xa5   : > { %600 = vst.msk [vmem:[#allocation2 + $0x8] sm:$0xff] %vm235_vm0, %v482_v9  ;;  %v518_v18 = vpop.f32.mrf.mxu1  ;;  %v708_v24 = vld [vmem:[#allocation2 + $0x60] sm:$0xff] }
  0xa6   : > { %612 = vst.msk [vmem:[#allocation2 + $0x68] sm:$0xff] %vm235_vm0, %v518_v18  ;;  %v545_v22 = vpop.f32.mrf.mxu2 }
  0xa7   : > { %621 = vst.msk [vmem:[#allocation2 + $0xb0] sm:$0xff] %vm235_vm0, %v545_v22 }
  0xa8   : > { %641 = vst.msk [vmem:[#allocation3] sm:$0xff] %vm235_vm0, %v639_v21 }
  0xac   : > { %v485_v14 = vpop.f32.mrf.mxu0  ;;  %v640_v28 = vld [vmem:[#allocation2 + $0x8] sm:$0xff] }
  0xad   : > { %601 = vst.msk [vmem:[#allocation2 + $0x10] sm:$0xff] %vm235_vm0, %v485_v14  ;;  %v521_v25 = vpop.f32.mrf.mxu1  ;;  %v709_v27 = vld [vmem:[#allocation2 + $0x68] sm:$0xff] }
  0xae   : > { %613 = vst.msk [vmem:[#allocation2 + $0x70] sm:$0xff] %vm235_vm0, %v521_v25  ;;  %714 = vrot.lane.b32.xlu2 %v709_v27, %s1295_s13  ;;  %v548_v29 = vpop.f32.mrf.mxu2  ;;  %v762_v3 = vld [vmem:[#allocation2 + $0xb0] sm:$0xff] }
  0xaf   : > { %622 = vst.msk [vmem:[#allocation2 + $0xb8] sm:$0xff] %vm235_vm0, %v548_v29  ;;  %766 = vrot.lane.b32.xlu1 %v762_v3, %s1296_s14 }
  0xb0   : > { %642 = vst.msk [vmem:[#allocation3 + $0x18] sm:$0xff] %vm235_vm0, %v640_v28 }
  0xb4   : > { %v488_v31 = vpop.f32.mrf.mxu0  ;;  %v643_v32 = vld [vmem:[#allocation2 + $0x10] sm:$0xff] }
  0xb5   : > { %602 = vst.msk [vmem:[#allocation2 + $0x18] sm:$0xff] %vm235_vm0, %v488_v31  ;;  %v524_v33 = vpop.f32.mrf.mxu1  ;;  %647 = vrot.lane.b32.xlu0 %v643_v32, %s1297_s20  ;;  %v721_v14 = vld [vmem:[#allocation2 + $0x70] sm:$0xff] }
  0xb6   : > { %614 = vst.msk [vmem:[#allocation2 + $0x78] sm:$0xff] %vm235_vm0, %v524_v33  ;;  %v551_v34 = vpop.f32.mrf.mxu2  ;;  %v763_v35 = vld [vmem:[#allocation2 + $0xb8] sm:$0xff] }
  0xb7   : > { %623 = vst.msk [vmem:[#allocation2 + $0xc0] sm:$0xff] %vm235_vm0, %v551_v34  ;;  %768 = vrot.lane.b32.xlu1 %v763_v35, %s1296_s14 }
  0xbc   : > { %v491_v36 = vpop.f32.mrf.mxu0  ;;  %v644_v37 = vld [vmem:[#allocation2 + $0x18] sm:$0xff] }
  0xbd   : > { %603 = vst.msk [vmem:[#allocation2 + $0x20] sm:$0xff] %vm235_vm0, %v491_v36  ;;  %v527_v38 = vpop.f32.mrf.mxu1  ;;  %649 = vrot.lane.b32.xlu0 %v644_v37, %s1297_s20  ;;  %v722_v18 = vld [vmem:[#allocation2 + $0x78] sm:$0xff] }
  0xbe   : > { %615 = vst.msk [vmem:[#allocation2 + $0x80] sm:$0xff] %vm235_vm0, %v527_v38  ;;  %v554_v39 = vpop.f32.mrf.mxu2  ;;  %v774_v40 = vld [vmem:[#allocation2 + $0xc0] sm:$0xff] }
  0xbf   : > { %624 = vst.msk [vmem:[#allocation2 + $0xc8] sm:$0xff] %vm235_vm0, %v554_v39  ;;  %778 = vrot.lane.b32.xlu1 %v774_v40, %s1298_s22 }
  0xc2   : > { %v575_v25 = vpop.f32.mrf.mxu3 }
  0xc3   : > { %631 = vst.msk [vmem:[#allocation2 + $0x100] sm:$0xff] %vm235_vm0, %v575_v25 }
  0xc4   : > { %v494_v41 = vpop.f32.mrf.mxu0  ;;  %v656_v42 = vld [vmem:[#allocation2 + $0x20] sm:$0xff] }
  0xc5   : > { %604 = vst.msk [vmem:[#allocation2 + $0x28] sm:$0xff] %vm235_vm0, %v494_v41  ;;  %v530_v43 = vpop.f32.mrf.mxu1  ;;  %v734_v44 = vld [vmem:[#allocation2 + $0x80] sm:$0xff] }
  0xc6   : > { %616 = vst.msk [vmem:[#allocation2 + $0x88] sm:$0xff] %vm235_vm0, %v530_v43  ;;  %v557_v45 = vpop.f32.mrf.mxu2  ;;  %v775_v46 = vld [vmem:[#allocation2 + $0xc8] sm:$0xff] }
  0xc7   : > { %625 = vst.msk [vmem:[#allocation2 + $0xd0] sm:$0xff] %vm235_vm0, %v557_v45  ;;  %780 = vrot.lane.b32.xlu2 %v775_v46, %s1298_s22  ;;  %660 = vrot.lane.b32.xlu1 %v656_v42, %s1299_s23 }
  0xc8   : > { %736 = vst.msk [vmem:[#allocation3 + $0x8] sm:$0xff] %vm235_vm0, %v734_v44 }
  0xca   : > { %v578_v28 = vpop.f32.mrf.mxu3  ;;  %v822_v26 = vld [vmem:[#allocation2 + $0x100] sm:$0xff] }
  0xcb   : > { %632 = vst.msk [vmem:[#allocation2 + $0x108] sm:$0xff] %vm235_vm0, %v578_v28 }
  0xcc   : > { %v497_v16 = vpop.f32.mrf.mxu0  ;;  %v657_v47 = vld [vmem:[#allocation2 + $0x28] sm:$0xff]  ;;  %824 = vst.msk [vmem:[#allocation3 + $0x10] sm:$0xff] %vm235_vm0, %v822_v26 }
  0xcd   : > { %605 = vst.msk [vmem:[#allocation2 + $0x30] sm:$0xff] %vm235_vm0, %v497_v16  ;;  %v533_v48 = vpop.f32.mrf.mxu1  ;;  %662 = vrot.lane.b32.xlu0 %v657_v47, %s1299_s23  ;;  %v735_v49 = vld [vmem:[#allocation2 + $0x88] sm:$0xff] }
  0xce   : > { %617 = vst.msk [vmem:[#allocation2 + $0x90] sm:$0xff] %vm235_vm0, %v533_v48  ;;  %v560_v50 = vpop.f32.mrf.mxu2  ;;  %v786_v51 = vld [vmem:[#allocation2 + $0xd0] sm:$0xff] }
  0xcf   : > { %626 = vst.msk [vmem:[#allocation2 + $0xd8] sm:$0xff] %vm235_vm0, %v560_v50  ;;  %790 = vrot.lane.b32.xlu2 %v786_v51, %s1300_s27 }
  0xd0   : > { %737 = vst.msk [vmem:[#allocation3 + $0x20] sm:$0xff] %vm235_vm0, %v735_v49 }
  0xd2   : > { %v581_v20 = vpop.f32.mrf.mxu3  ;;  %v823_v40 = vld [vmem:[#allocation2 + $0x108] sm:$0xff] }
  0xd3   : > { %633 = vst.msk [vmem:[#allocation2 + $0x110] sm:$0xff] %vm235_vm0, %v581_v20 }
  0xd4   : > { %v500_v52 = vpop.f32.mrf.mxu0  ;;  %v669_v57 = vld [vmem:[#allocation2 + $0x30] sm:$0xff]  ;;  %825 = vst.msk [vmem:[#allocation3 + $0x28] sm:$0xff] %vm235_vm0, %v823_v40 }
  0xd5   : > { %606 = vst.msk [vmem:[#allocation2 + $0x38] sm:$0xff] %vm235_vm0, %v500_v52  ;;  %v536_v53 = vpop.f32.mrf.mxu1  ;;  %v738_v54 = vld [vmem:[#allocation2 + $0x90] sm:$0xff] }
  0xd6   : > { %618 = vst.msk [vmem:[#allocation2 + $0x98] sm:$0xff] %vm235_vm0, %v536_v53  ;;  %742 = vrot.lane.b32.xlu1 %v738_v54, %s1297_s20  ;;  %v563_v55 = vpop.f32.mrf.mxu2  ;;  %v787_v56 = vld [vmem:[#allocation2 + $0xd8] sm:$0xff] }
  0xd7   : > { %627 = vst.msk [vmem:[#allocation2 + $0xe0] sm:$0xff] %vm235_vm0, %v563_v55  ;;  %792 = vrot.lane.b32.xlu2 %v787_v56, %s1300_s27 }
  0xda   : > { %v584_v33 = vpop.f32.mrf.mxu3  ;;  %v826_v38 = vld [vmem:[#allocation2 + $0x110] sm:$0xff] }
  0xdb   : > { %634 = vst.msk [vmem:[#allocation2 + $0x118] sm:$0xff] %vm235_vm0, %v584_v33 }
  0xdc   : > { %v503_v58 = vpop.f32.mrf.mxu0  ;;  %v670_v0 = vld [vmem:[#allocation2 + $0x38] sm:$0xff] }
  0xdd   : > { %607 = vst.msk [vmem:[#allocation2 + $0x40] sm:$0xff] %vm235_vm0, %v503_v58  ;;  %v539_v59 = vpop.f32.mrf.mxu1  ;;  %v739_v60 = vld [vmem:[#allocation2 + $0x98] sm:$0xff] }
  0xde   : > { %619 = vst.msk [vmem:[#allocation2 + $0xa0] sm:$0xff] %vm235_vm0, %v539_v59  ;;  %744 = vrot.lane.b32.xlu0 %v739_v60, %s1297_s20  ;;  %673 = vrot.lane.b32.xlu1 %v669_v57, %s1296_s14  ;;  %v566_v61 = vpop.f32.mrf.mxu2  ;;  %v798_v62 = vld [vmem:[#allocation2 + $0xe0] sm:$0xff] }
  0xdf   : > { %628 = vst.msk [vmem:[#allocation2 + $0xe8] sm:$0xff] %vm235_vm0, %v566_v61 }
  0xe2   : > { %v587_v5 = vpop.f32.mrf.mxu3  ;;  %v827_v41 = vld [vmem:[#allocation2 + $0x118] sm:$0xff] }
  0xe3   : > { %635 = vst.msk [vmem:[#allocation2 + $0x120] sm:$0xff] %vm235_vm0, %v587_v5 }
  0xe4   : > { %v506_v63 = vpop.f32.mrf.mxu0  ;;  %v682_v17 = vld [vmem:[#allocation2 + $0x40] sm:$0xff] }
  0xe5   : > { %608 = vst.msk [vmem:[#allocation2 + $0x48] sm:$0xff] %vm235_vm0, %v506_v63  ;;  %v542_v1 = vpop.f32.mrf.mxu1  ;;  %v750_v7 = vld [vmem:[#allocation2 + $0xa0] sm:$0xff] }
  0xe6   : > { %620 = vst.msk [vmem:[#allocation2 + $0xa8] sm:$0xff] %vm235_vm0, %v542_v1  ;;  %754 = vrot.lane.b32.xlu2 %v750_v7, %s1299_s23  ;;  %802 = vrot.lane.b32.xlu0 %v798_v62, %s1295_s13  ;;  %v569_v11 = vpop.f32.mrf.mxu2  ;;  %v799_v13 = vld [vmem:[#allocation2 + $0xe8] sm:$0xff]  ;;  %v862_v63 = vld [vmem:[%s1753_s0] sm:$0xff] }
  0xe7   : > { %675 = vrot.lane.b32.xlu1 %v670_v0, %s1296_s14  ;;  %629 = vst.msk [vmem:[#allocation2 + $0xf0] sm:$0xff] %vm235_vm0, %v569_v11  ;;  %v863_v7 = vld [vmem:[%s1753_s0 + $0x8] sm:$0xff] }
  0xea   : > { %v590_v39 = vpop.f32.mrf.mxu3  ;;  %v838_v49 = vld [vmem:[#allocation2 + $0x120] sm:$0xff] }
  0xeb   : > { %636 = vst.msk [vmem:[#allocation2 + $0x128] sm:$0xff] %vm235_vm0, %v590_v39 }
  0xec   : > { %v509_v15 = vpop.f32.mrf.mxu0  ;;  %v683_v12 = vld [vmem:[#allocation2 + $0x48] sm:$0xff] }
  0xed   : > { %609 = vst.msk [vmem:[#allocation2 + $0x50] sm:$0xff] %vm235_vm0, %v509_v15  ;;  %v751_v19 = vld [vmem:[#allocation2 + $0xa8] sm:$0xff] }
  0xee   : > { %804 = vrot.lane.b32.xlu2 %v799_v13, %s1295_s13  ;;  %756 = vrot.lane.b32.xlu0 %v751_v19, %s1299_s23  ;;  %v572_v2 = vpop.f32.mrf.mxu2  ;;  %v810_v4 = vld [vmem:[#allocation2 + $0xf0] sm:$0xff] }
  0xef   : > { %686 = vrot.lane.b32.xlu1 %v682_v17, %s1298_s22  ;;  %630 = vst.msk [vmem:[#allocation2 + $0xf8] sm:$0xff] %vm235_vm0, %v572_v2 }
  0xf2   : > { %v593_v42 = vpop.f32.mrf.mxu3  ;;  %v839_v45 = vld [vmem:[#allocation2 + $0x128] sm:$0xff] }
  0xf3   : > { %637 = vst.msk [vmem:[#allocation2 + $0x130] sm:$0xff] %vm235_vm0, %v593_v42 }
  0xf4   : > { %v512_v9 = vpop.f32.mrf.mxu0  ;;  %v695_v23 = vld [vmem:[#allocation2 + $0x50] sm:$0xff] }
  0xf5   : > { %610 = vst.msk [vmem:[#allocation2 + $0x58] sm:$0xff] %vm235_vm0, %v512_v9 }
  0xf6   : > { %814 = vrot.lane.b32.xlu0 %v810_v4, %s1301_s28  ;;  %688 = vrot.lane.b32.xlu2 %v683_v12, %s1298_s22  ;;  %v811_v21 = vld [vmem:[#allocation2 + $0xf8] sm:$0xff] }
  0xf7   : > { %727 = vrot.lane.b32.xlu1 %v722_v18, %s1301_s28 }
  0xfa   : > { %v596_v46 = vpop.f32.mrf.mxu3  ;;  %v850_v48 = vld [vmem:[#allocation2 + $0x130] sm:$0xff] }
  0xfb   : > { %638 = vst.msk [vmem:[#allocation2 + $0x138] sm:$0xff] %vm235_vm0, %v596_v46 }
  0xfc   : > { %v696_v22 = vld [vmem:[#allocation2 + $0x58] sm:$0xff] }
  0xfe   : > { %816 = vrot.lane.b32.xlu0 %v811_v21, %s1301_s28  ;;  %701 = vrot.lane.b32.xlu2 %v696_v22, %s1300_s27 }
  0xff   : > { %832 = vrot.lane.b32.xlu1 %v827_v41, %s1297_s20 }
 0x102   : > { %v851_v50 = vld [vmem:[#allocation2 + $0x138] sm:$0xff] }
 0x106   : > { %699 = vrot.lane.b32.xlu0 %v695_v23, %s1300_s27  ;;  %712 = vrot.lane.b32.xlu2 %v708_v24, %s1295_s13  ;;  %s1052_s13 = sshll.u32 %s1048_s10, 4  ;;  %s1251_s27 = scalar_lea.hbm %s1757_s4, 2  ;;  %s1053_s13 = int_to_ptr.hbm [resolvable:$true] %s1052_s13 }
 0x107   : > { %856 = vrot.lane.b32.xlu1 %v851_v50, %s1296_s14 }
 0x108   : > { %v1645_v27 = vpop.permute.xlu2 %714 }
 0x10e   : > { %725 = vrot.lane.b32.xlu0 %v721_v14, %s1301_s28  ;;  %844 = vrot.lane.b32.xlu2 %v839_v45, %s1299_s23 }
 0x116   : > { %830 = vrot.lane.b32.xlu0 %v826_v38, %s1297_s20  ;;  %842 = vrot.lane.b32.xlu2 %v838_v49, %s1299_s23  ;;  %s1245_s20 = sshra.s32 %s1053_s13, 4  ;;  %s1246_s20 = int_to_ptr.hbm [resolvable:$true] %s1245_s20 }
 0x117   : > { %p1252_p0 = scmp.lt.s32.totalorder %s1246_s20, %s1757_s4 }
 0x11e   : > { %854 = vrot.lane.b32.xlu0 %v850_v48, %s1296_s14  ;;  %s1040_s14 = scalar_lea.sflag [#allocation5], %s205_s7 }
 0x121   : > { %v767_v29 = vpop.permute.xlu1 %766  ;;  %v1648_v3 = vpop.permute.xlu2 %780 }
 0x127   : > { %v648_v30 = vpop.permute.xlu0 %647 }
 0x128   : > { %654 = vst.msk [vmem:[#allocation3] sm:$0xff] %vm653_vm1, %v648_v30 }
 0x129   : > { %v1652_v31 = vpop.permute.xlu1 %768  ;;  %v791_v32 = vpop.permute.xlu2 %790 }
 0x12f   : > { %v650_v34 = vpop.permute.xlu0 %649 }
 0x130   : > { %655 = vst.msk [vmem:[#allocation3 + $0x18] sm:$0xff] %vm653_vm1, %v650_v34 }
 0x131   : > { %v779_v35 = vpop.permute.xlu1 %778  ;;  %v793_v36 = vpop.permute.xlu2 %792 }
 0x139   : > { %v661_v37 = vpop.permute.xlu1 %660 }
 0x13a   : > { %667 = vst.msk [vmem:[#allocation3] sm:$0xff] %vm666_vm2, %v661_v37 }
 0x13f   : > { %v663_v6 = vpop.permute.xlu0 %662 }
 0x140   : > { %v755_v10 = vpop.permute.xlu2 %754  ;;  %668 = vst.msk [vmem:[#allocation3 + $0x18] sm:$0xff] %vm666_vm2, %v663_v6 }
 0x148   : > { %v805_v43 = vpop.permute.xlu2 %804  ;;  %v743_v44 = vpop.permute.xlu1 %742 }
 0x149   : > { %748 = vst.msk [vmem:[#allocation3 + $0x8] sm:$0xff] %vm653_vm1, %v743_v44 }
 0x14a   : > { %760 = vst.msk [vmem:[#allocation3 + $0x8] sm:$0xff] %vm666_vm2, %v755_v10 }
 0x14b   : > { %772 = vst.msk [vmem:[#allocation3 + $0x8] sm:$0xff] %vm679_vm3, %v767_v29 }
 0x14c   : > { %784 = vst.msk [vmem:[#allocation3 + $0x8] sm:$0xff] %vm692_vm4, %v779_v35 }
 0x14d   : > { %796 = vst.msk [vmem:[#allocation3 + $0x8] sm:$0xff] %vm705_vm5, %v791_v32 }
 0x150   : > { %v745_v8 = vpop.permute.xlu0 %744  ;;  %v674_v16 = vpop.permute.xlu1 %673 }
 0x151   : > { %749 = vst.msk [vmem:[#allocation3 + $0x20] sm:$0xff] %vm653_vm1, %v745_v8  ;;  %v689_v47 = vpop.permute.xlu2 %688 }
 0x152   : > { %680 = vst.msk [vmem:[#allocation3] sm:$0xff] %vm679_vm3, %v674_v16 }
 0x158   : > { %v803_v51 = vpop.permute.xlu0 %802 }
 0x159   : > { %808 = vst.msk [vmem:[#allocation3 + $0x8] sm:$0xff] %vm718_vm6, %v803_v51  ;;  %v676_v52 = vpop.permute.xlu1 %675  ;;  %v702_v53 = vpop.permute.xlu2 %701 }
 0x15a   : > { %681 = vst.msk [vmem:[#allocation3 + $0x18] sm:$0xff] %vm679_vm3, %v676_v52 }
 0x15b   : > { %694 = vst.msk [vmem:[#allocation3 + $0x18] sm:$0xff] %vm692_vm4, %v689_v47 }
 0x15c   : > { %707 = vst.msk [vmem:[#allocation3 + $0x18] sm:$0xff] %vm705_vm5, %v702_v53 }
 0x15d   : > { %720 = vst.msk [vmem:[#allocation3 + $0x18] sm:$0xff] %vm718_vm6, %v1645_v27 }
 0x160   : > { %v757_v54 = vpop.permute.xlu0 %756 }
 0x161   : > { %761 = vst.msk [vmem:[#allocation3 + $0x20] sm:$0xff] %vm666_vm2, %v757_v54  ;;  %v687_v55 = vpop.permute.xlu1 %686  ;;  %v713_v62 = vpop.permute.xlu2 %712 }
 0x162   : > { %773 = vst.msk [vmem:[#allocation3 + $0x20] sm:$0xff] %vm679_vm3, %v1652_v31 }
 0x163   : > { %785 = vst.msk [vmem:[#allocation3 + $0x20] sm:$0xff] %vm692_vm4, %v1648_v3 }
 0x164   : > { %797 = vst.msk [vmem:[#allocation3 + $0x20] sm:$0xff] %vm705_vm5, %v793_v36 }
 0x165   : > { %693 = vst.msk [vmem:[#allocation3] sm:$0xff] %vm692_vm4, %v687_v55 }
 0x166   : > { %809 = vst.msk [vmem:[#allocation3 + $0x20] sm:$0xff] %vm718_vm6, %v805_v43 }
 0x168   : > { %v815_v56 = vpop.permute.xlu0 %814 }
 0x169   : > { %820 = vst.msk [vmem:[#allocation3 + $0x8] sm:$0xff] %vm731_vm7, %v815_v56  ;;  %v728_v57 = vpop.permute.xlu1 %727  ;;  %v845_v13 = vpop.permute.xlu2 %844 }
 0x16a   : > { %733 = vst.msk [vmem:[#allocation3 + $0x18] sm:$0xff] %vm731_vm7, %v728_v57 }
 0x170   : > { %v817_v58 = vpop.permute.xlu0 %816  ;;  %v865_v0 = vld [vmem:[#allocation3 + $0x8] sm:$0xff] }
 0x171   : > { %821 = vst.msk [vmem:[#allocation3 + $0x20] sm:$0xff] %vm731_vm7, %v817_v58  ;;  %v867_v59 = vld [vmem:[#allocation3 + $0x18] sm:$0xff]  ;;  %v843_v17 = vpop.permute.xlu2 %842  ;;  %v833_v19 = vpop.permute.xlu1 %832 }
 0x172   : > { %890 = vmatpush.msrb.mxu1 %v867_v59  ;;  %837 = vst.msk [vmem:[#allocation3 + $0x28] sm:$0xff] %vm653_vm1, %v833_v19 }
 0x173   : > { %849 = vst.msk [vmem:[#allocation3 + $0x28] sm:$0xff] %vm666_vm2, %v845_v13 }
 0x178   : > { %v700_v60 = vpop.permute.xlu0 %699  ;;  %v868_v61 = vld [vmem:[#allocation3 + $0x20] sm:$0xff] }
 0x179   : > { %706 = vst.msk [vmem:[#allocation3] sm:$0xff] %vm705_vm5, %v700_v60  ;;  %913 = vmatpush.msrb.mxu2 %v868_v61  ;;  %v857_v4 = vpop.permute.xlu1 %856 }
 0x17a   : > { %719 = vst.msk [vmem:[#allocation3] sm:$0xff] %vm718_vm6, %v713_v62 }
 0x17b   : > { %914 = vmatpush.msrb.mxu2 %v865_v0  ;;  %861 = vst.msk [vmem:[#allocation3 + $0x28] sm:$0xff] %vm679_vm3, %v857_v4 }
 0x17c   : > { %1169 = vmatmul.msk.f32.vlgmr.msrb.gmra.mxu2 %vm235_vm0, %v862_v63 }
 0x180   : > { %v726_v1 = vpop.permute.xlu0 %725 }
 0x181   : > { %732 = vst.msk [vmem:[#allocation3] sm:$0xff] %vm731_vm7, %v726_v1 }
 0x182   : > { %v869_v12 = vld [vmem:[#allocation3 + $0x28] sm:$0xff] }
 0x183   : > { %936 = vmatpush.msrb.mxu3 %v869_v12 }
 0x184   : > { %1170 = vmatmul.msk.f32.gmra.mxu2 %vm235_vm0, %v863_v7 }
 0x188   : > { %v864_v11 = vld [vmem:[#allocation3] sm:$0xff]  ;;  %v831_v15 = vpop.permute.xlu0 %830 }
 0x189   : > { %891 = vmatpush.msrb.mxu1 %v864_v11  ;;  %836 = vst.msk [vmem:[#allocation3 + $0x10] sm:$0xff] %vm653_vm1, %v831_v15  ;;  %vm1037_vm1 = vcmask 516096  }
 0x18a   : > { %1167 = vmatmul.msk.f32.vlgmr.msrb.gmra.mxu1 %vm235_vm0, %v862_v63  ;;  %848 = vst.msk [vmem:[#allocation3 + $0x10] sm:$0xff] %vm666_vm2, %v843_v17 }
 0x190   : > { %v855_v2 = vpop.permute.xlu0 %854 }
 0x191   : > { %860 = vst.msk [vmem:[#allocation3 + $0x10] sm:$0xff] %vm679_vm3, %v855_v2 }
 0x192   : > { %1168 = vmatmul.msk.f32.gmra.mxu1 %vm235_vm0, %v863_v7 }
 0x198   : > { %v866_v9 = vld [vmem:[#allocation3 + $0x10] sm:$0xff] }
 0x199   : > { %937 = vmatpush.msrb.mxu3 %v866_v9 }
 0x19a   : > { %1171 = vmatmul.msk.f32.vlgmr.msrb.gmra.mxu3 %vm235_vm0, %v862_v63 }
 0x1a2   : > { %1172 = vmatmul.msk.f32.gmra.mxu3 %vm235_vm0, %v863_v7  ;;  %vm1027_vm0 = vcmask 523264  }
 0x1ff   : > { %v916_v18 = vpop.f32.mrf.mxu2 }
 0x207   : > { %v893_v21 = vpop.f32.mrf.mxu1  ;;  %v919_v14 = vpop.f32.mrf.mxu2 }
 0x208   : > { %v945_v22 = vmul.f32 %v893_v21, %v893_v21 }
 0x20a   : > { %v957_v23 = vsub.f32 %v916_v18, %v945_v22  ;;  %973 = vrot.lane.b32.xlu1 %v945_v22, %s1298_s22 }
 0x20c   : > { %985 = vrot.lane.b32.xlu0 %v957_v23, %s1298_s22 }
 0x20f   : > { %v896_v24 = vpop.f32.mrf.mxu1 }
 0x210   : > { %v946_v25 = vmul.f32 %v896_v24, %v896_v24 }
 0x212   : > { %v958_v27 = vsub.f32 %v919_v14, %v946_v25  ;;  %975 = vrot.lane.b32.xlu2 %v946_v25, %s1298_s22 }
 0x214   : > { %951 = vrot.lane.b32.xlu0 %v896_v24, %s1298_s22  ;;  %987 = vrot.lane.b32.xlu1 %v958_v27, %s1298_s22 }
 0x21a   : > { %949 = vrot.lane.b32.xlu2 %v893_v21, %s1298_s22  ;;  %s1247_s22 = scalar_lea.hbm %s1246_s20, 1 }
 0x21b   : > { %p1248_p11 = scmp.ne.s32.totalorder %s1246_s20, %s1247_s22  ;;  %p1253_p1 = scmp.lt.s32.totalorder %s1251_s27, %s1247_s22 }
 0x21d   : > { %v939_v35 = vpop.f32.mrf.mxu3  ;;  %p1249_p12 = pnand %p1248_p11, %p1365_p5  ;;  %p1254_p2 = por %p1253_p1, %p1252_p0 }
 0x21f   : > { %p1250_p13 = pneg %p1249_p12 }
 0x221   : > { %p1255_p3 = pnand %p1254_p2, %p1250_p13 }
 0x225   : > { %v942_v43 = vpop.f32.mrf.mxu3 }
 0x26c   : > { %v976_v29 = vpop.permute.xlu2 %975 }
 0x26d   : > { %v980_v34 = vadd.f32 %v976_v29, %v946_v25 }
 0x26f   : > { %v982_v37 = vadd.f32 0.0001, %v980_v34 }
 0x274   : > { %v950_v26 = vpop.permute.xlu2 %949 }
 0x275   : > { %v955_v40 = vmul.f32 %v950_v26, %v893_v21 }
 0x277   : > { %v959_v44 = vsub.f32 %v939_v35, %v955_v40  ;;  %v961_v49 = vmul.f32 2.0, %v955_v40 }
 0x279   : > { %v965_v16 = vmul.f32 2.0, %v959_v44  ;;  %v963_v58 = vadd.f32 0.0001, %v961_v49 }
 0x27b   : > { %v967_v54 = vadd.f32 0.0009, %v965_v16 }
 0x27c   : > { %v974_v28 = vpop.permute.xlu1 %973 }
 0x27d   : > { %v979_v3 = vadd.f32 %v974_v28, %v945_v22  ;;  %v969_v1 = vmul.f32 %v967_v54, %v963_v58 }
 0x27e   : > { %v986_v20 = vpop.permute.xlu0 %985 }
 0x27f   : > { %v991_v30 = vadd.f32 %v986_v20, %v957_v23  ;;  %v981_v31 = vadd.f32 0.0001, %v979_v3 }
 0x281   : > { %v993_v32 = vadd.f32 0.0009, %v991_v30 }
 0x283   : > { %v995_v33 = vmul.f32 %v993_v32, %v981_v31 }
 0x285   : > { %1227 = vrcp.f32 %v995_v33  ;;  %v1008_v50 = vand.u32 2147483648, %v995_v33  ;;  %v1006_v51 = vand.u32 2147483647, %v995_v33  ;;  %vm1002_vm9 = vweird.f32 %v995_v33 }
 0x286   : > { %v988_v5 = vpop.permute.xlu1 %987  ;;  %v952_v38 = vpop.permute.xlu0 %951 }
 0x287   : > { %v992_v36 = vadd.f32 %v988_v5, %v958_v27  ;;  %v956_v42 = vmul.f32 %v952_v38, %v896_v24  ;;  %v1009_v59 = vor.u32 1.1754944e-38, %v1008_v50  ;;  %vm1007_vm11 = vcmp.eq.f32.partialorder %v1006_v51, 8.507059e+37 }
 0x289   : > { %v994_v39 = vadd.f32 0.0009, %v992_v36  ;;  %v960_v8 = vsub.f32 %v942_v43, %v956_v42  ;;  %v962_v55 = vmul.f32 2.0, %v956_v42 }
 0x28b   : > { %v1228_v6 = vpop.eup %1227  ;;  %v996_v10 = vmul.f32 %v994_v39, %v982_v37  ;;  %v966_v53 = vmul.f32 2.0, %v960_v8  ;;  %v964_v7 = vadd.f32 0.0001, %v962_v55 }
 0x28c   : > { %v998_v41 = vmul.f32 %v1228_v6, %v995_v33  ;;  %vm1003_vm8 = vweird.f32 %v1228_v6 }
 0x28d   : > { %1229 = vrcp.f32 %v996_v10  ;;  %vm1004_vm10 = vmor %vm1002_vm9, %vm1003_vm8  ;;  %v1023_v60 = vand.u32 2147483648, %v996_v10  ;;  %v968_v61 = vadd.f32 0.0009, %v966_v53  ;;  %v1021_v63 = vand.u32 2147483647, %v996_v10 }
 0x28e   : > { %v999_v45 = vsub.f32 1.0, %v998_v41  ;;  %vm1017_vm13 = vweird.f32 %v996_v10 }
 0x28f   : > { %v1024_v13 = vor.u32 1.1754944e-38, %v1023_v60  ;;  %v970_v15 = vmul.f32 %v968_v61, %v964_v7  ;;  %vm1022_vm15 = vcmp.eq.f32.partialorder %v1021_v63, 8.507059e+37 }
 0x290   : > { %v1000_v46 = vmul.f32 %v1228_v6, %v999_v45 }
 0x292   : > { %v1001_v47 = vadd.f32 %v1228_v6, %v1000_v46 }
 0x293   : > { %v1230_v48 = vpop.eup %1229 }
 0x294   : > { %v1013_v52 = vmul.f32 %v1230_v48, %v996_v10  ;;  %v1005_v57 = vsel %vm1004_vm10, %v1228_v6, %v1001_v47  ;;  %vm1018_vm12 = vweird.f32 %v1230_v48 }
 0x295   : > { %v1010_v0 = vsel %vm1007_vm11, %v1009_v59, %v1005_v57  ;;  %vm1019_vm14 = vmor %vm1017_vm13, %vm1018_vm12 }
 0x296   : > { %v1014_v56 = vsub.f32 1.0, %v1013_v52  ;;  %v1011_v17 = vmul.f32 %v1010_v0, %v969_v1 }
 0x298   : > { %v1015_v62 = vmul.f32 %v1230_v48, %v1014_v56  ;;  %v1028_v12 = vsel %vm1027_vm0, %v1011_v17, 0.0 }
 0x29a   : > { %v1016_v11 = vadd.f32 %v1230_v48, %v1015_v62 }
 0x29c   : > { %v1020_v19 = vsel %vm1019_vm14, %v1230_v48, %v1016_v11 }
 0x29d   : > { %v1025_v2 = vsel %vm1022_vm15, %v1024_v13, %v1020_v19 }
 0x29e   : > { %v1026_v4 = vmul.f32 %v1025_v2, %v970_v15 }
 0x2a0   : > { %v1029_v9 = vsel %vm1027_vm0, %v1026_v4, 0.0 }
 0x2a1   : > { %v1030_v18 = vadd.f32 %v1029_v9, %v1028_v12 }
 0x2a3   : > { %v1031_v21 = vrot.slane %v1030_v18, 4 }
 0x2a5   : > { %v1032_v22 = vadd.f32 %v1031_v21, %v1030_v18 }
 0x2a7   : > { %v1033_v23 = vrot.slane %v1032_v22, 2 }
 0x2a9   : > { %v1034_v24 = vadd.f32 %v1033_v23, %v1032_v22 }
 0x2ab   : > { %v1035_v14 = vrot.slane %v1034_v24, 1 }
 0x2ad   : > { %v1036_v25 = vadd.f32 %v1035_v14, %v1034_v24 }
 0x2af   : > { %1038 = vst.msk [vmem:[%s206_s11] sm:$0x1] %vm1037_vm1, %v1036_v25 }
 0x2b0   : > { %1258 = shalt.err (!%p1255_p3)
}
 0x2b1   : > { %1181 = dma.vmem_to_hbm [thread:$0]  (%p1365_p5), %s1051_s12, 16, %s1053_s13, %s1040_s14  }
 0x2b2 PF: > { %p1187_p4 = scmp.ge.s32.totalorder %s1293_s18, 2  ;;  %s1064_s30 = sand.u32 1, %s1281_s15  }
 0x2b3   : > { %s1065_s5 = scalar_lea.sflag [#allocation5], %s1064_s30 }
 0x2b4   : > { %p1184_p7 = pnand %p1187_p4, %p1369_p6 }
 0x2b6   : > { %p1185_p8 = pneg %p1184_p7 }
 0x2b8   : > { %1276 = dma.done.wait (%p1185_p8), %s1065_s5, 16  }
 0x2b9   : > { %1278 = vsyncadd (%p1185_p8), %s1065_s5, 4294967280  ;;  %p14_p9 = scmp.ge.s32.totalorder %s1352_s21, 4   ;;  %s1760_s15 = smov %s1285_s16 }
 0x2ba   : > { %s1761_s16 = smov %s1289_s17  ;;  %s1762_s17 = smov %s1363_s24 }
 0x2bb   : > { %s1763_s18 = smov %s1352_s21  ;;  %16 = sbr.rel (!%p14_p9) target bundleno = 3 (0x3), region = 74 }
 0x2c0   :  { %1070 = vsyncpa [#allocation5], 1 }
 0x2c1   :  { %1072 = vsyncpa [#allocation5 + $0x1], 1 }

</bundles_post_ra>
